<compile_context>
chip_gen: v7x
topology: tpu7x:2x2x1
jax: 0.10.0
libtpu: 0.0.40
codegen_flags: <defaults>
</compile_context>

<pallas_src>
import jax
import jax.numpy as jnp
import numpy as np
from jax.experimental import pallas as pl
from jax.experimental.pallas import tpu as pltpu


# ---------------------------------------------------------------------------
# small helpers
# ---------------------------------------------------------------------------
def _cdiv(a, b):
    return -(-a // b)


def _round_up(v, m):
    return _cdiv(v, m) * m


def _padded_vmem_bytes(block_shape, dtype):
    """VMEM bytes of one pipeline buffer for `block_shape`, accounting for the
    (sublane, 128-lane) tiled layout padding of the trailing two dims."""
    itemsize = np.dtype(dtype).itemsize
    sub = max(8, 32 // itemsize)          # 8 for f32, 16 for bf16, 32 for int8
    dims = (1,) * max(0, 2 - len(block_shape)) + tuple(block_shape)
    lead = 1
    for d in dims[:-2]:
        lead *= d
    return lead * _round_up(dims[-2], sub) * _round_up(dims[-1], 128) * itemsize


_VMEM_BUDGET = 26 * 2**20        # double-buffered working-set target (v7x-safe)
_VMEM_LIMIT_CAP = 48 * 2**20     # never ask for more (v7x has 64 MiB physical)


def _pick_tile_b(B, tile_b, per_row_bytes, resident_bytes):
    """Batch tile: as large as the VMEM budget allows, but >=2 batch tiles when
    possible so v7x's two TensorCores both get work."""
    TB = max(16, _round_up(min(tile_b, B), 16))
    if B > 16 and 2 * TB > B:
        TB = max(16, _round_up(_cdiv(B, 2), 16))
    while TB > 16 and 2 * TB * per_row_bytes + resident_bytes > _VMEM_BUDGET:
        TB = max(16, _round_up(TB // 2, 16))
    return TB


def _vmem_limit(footprint_bytes):
    return int(min(_VMEM_LIMIT_CAP, max(32 * 2**20, footprint_bytes + 8 * 2**20)))


# ---------------------------------------------------------------------------
# fused small-N path: one lane-dense matmul against a block-diagonal weight
# ---------------------------------------------------------------------------
def _fused_kernel_bias(x_ref, w_ref, b_ref, o_ref):
    acc = jnp.dot(x_ref[...], w_ref[...], preferred_element_type=jnp.float32)
    acc = acc + b_ref[...].astype(jnp.float32)          # (1, N*D_out) broadcast
    o_ref[...] = acc.astype(o_ref.dtype)


def _fused_kernel_nobias(x_ref, w_ref, o_ref):
    o_ref[...] = jnp.dot(
        x_ref[...], w_ref[...], preferred_element_type=jnp.float32
    ).astype(o_ref.dtype)


def _nlinear_fused(x, weight, bias, tile_b, out_dtype):
    B, N, D_in = x.shape
    D_out = weight.shape[-1]
    K, M = N * D_in, N * D_out

    # Free reshapes (collapse contiguous trailing dims) -- no extra HBM passes.
    x2 = x.reshape(B, K)
    # Tiny block-diagonal weight, built once; stays VMEM-resident in the kernel.
    eye = jnp.eye(N, dtype=weight.dtype)
    w_bd = jnp.einsum("nio,nm->nimo", weight, eye).reshape(K, M)

    resident = 2 * _padded_vmem_bytes((K, M), w_bd.dtype)
    operands = [x2, w_bd]
    if bias is not None:
        b2 = bias.reshape(1, M)
        operands.append(b2)
        resident += 2 * _padded_vmem_bytes((1, M), b2.dtype)

    per_row = (_padded_vmem_bytes((1, K), x2.dtype)
               + _padded_vmem_bytes((1, M), out_dtype))
    TB = _pick_tile_b(B, tile_b, per_row, resident)
    footprint = 2 * TB * per_row + resident

    in_specs = [
        pl.BlockSpec((TB, K), lambda b: (b, 0)),        # batch-tiled activations
        pl.BlockSpec((K, M), lambda b: (0, 0)),         # resident weight
    ]
    if bias is not None:
        in_specs.append(pl.BlockSpec((1, M), lambda b: (0, 0)))
    kernel = _fused_kernel_bias if bias is not None else _fused_kernel_nobias

    bytes_accessed = (x2.size * x2.dtype.itemsize
                      + w_bd.size * w_bd.dtype.itemsize
                      + (0 if bias is None else bias.size * bias.dtype.itemsize)
                      + B * M * np.dtype(out_dtype).itemsize)
    cost = pl.CostEstimate(flops=2 * B * K * M, transcendentals=0,
                           bytes_accessed=int(bytes_accessed))

    out2 = pl.pallas_call(
        kernel,
        out_shape=jax.ShapeDtypeStruct((B, M), out_dtype),
        grid=(_cdiv(B, TB),),            # ragged last block: OOB rows dropped
        in_specs=in_specs,
        out_specs=pl.BlockSpec((TB, M), lambda b: (b, 0)),
        compiler_params=pltpu.CompilerParams(
            dimension_semantics=("parallel",),
            vmem_limit_bytes=_vmem_limit(footprint),
        ),
        cost_estimate=cost,
    )(*operands)
    return out2.reshape(B, N, D_out)


# ---------------------------------------------------------------------------
# general path: per-feature MXU matmuls over (TB, TN, D) blocks
# ---------------------------------------------------------------------------
def _make_grouped_kernel(tn, has_bias):
    if has_bias:
        def kernel(x_ref, w_ref, b_ref, o_ref):
            for t in range(tn):                      # short static unroll
                acc = jnp.dot(x_ref[:, t, :], w_ref[t],
                              preferred_element_type=jnp.float32)
                acc = acc + b_ref[t:t + 1, :].astype(jnp.float32)   # 2-D slice
                o_ref[:, t, :] = acc.astype(o_ref.dtype)            # store now
    else:
        def kernel(x_ref, w_ref, o_ref):
            for t in range(tn):
                acc = jnp.dot(x_ref[:, t, :], w_ref[t],
                              preferred_element_type=jnp.float32)
                o_ref[:, t, :] = acc.astype(o_ref.dtype)
    return kernel


def _nlinear_grouped(x, weight, bias, tile_b, out_dtype):
    B, N, D_in = x.shape
    D_out = weight.shape[-1]
    sub = max(8, 32 // x.dtype.itemsize)

    # Feature tile: whole-N when small (single grid axis, contiguous HBM rows,
    # weight fully resident); otherwise a sublane-dense tile kept small enough
    # that the static unroll and the resident weight tile stay modest.
    if N <= 64:
        TN = N
    else:
        TN = 64
        while TN > sub and TN * D_in * D_out * weight.dtype.itemsize > 4 * 2**20:
            TN = max(sub, TN // 2)
    n_tiles = _cdiv(N, TN)

    # Pad ONLY the tiny weight/bias along N; x/out are streamed unpadded.
    N_p = n_tiles * TN
    if N_p != N:
        weight = jnp.pad(weight, ((0, N_p - N), (0, 0), (0, 0)))
        if bias is not None:
            bias = jnp.pad(bias, ((0, N_p - N), (0, 0)))

    resident = 2 * _padded_vmem_bytes((TN, D_in, D_out), weight.dtype)
    if bias is not None:
        resident += 2 * _padded_vmem_bytes((TN, D_out), bias.dtype)
    per_row = (_padded_vmem_bytes((1, TN, D_in), x.dtype)
               + _padded_vmem_bytes((1, TN, D_out), out_dtype))
    TB = _pick_tile_b(B, tile_b, per_row, resident)
    footprint = 2 * TB * per_row + resident

    kernel = _make_grouped_kernel(TN, bias is not None)

    if n_tiles == 1:
        grid = (_cdiv(B, TB),)
        x_spec = pl.BlockSpec((TB, TN, D_in), lambda b: (b, 0, 0))
        w_spec = pl.BlockSpec((TN, D_in, D_out), lambda b: (0, 0, 0))
        b_spec = pl.BlockSpec((TN, D_out), lambda b: (0, 0))
        o_spec = pl.BlockSpec((TB, TN, D_out), lambda b: (b, 0, 0))
        semantics = ("parallel",)
    else:
        # Batch axis innermost: the weight/bias tile (index depends only on n)
        # is fetched once per feature tile and stays VMEM-resident across all
        # batch steps.  Both axes write disjoint output blocks ("parallel");
        # the outer feature axis has >=2 tiles here, so v7x's two TensorCores
        # both get work.
        grid = (n_tiles, _cdiv(B, TB))
        x_spec = pl.BlockSpec((TB, TN, D_in), lambda n, b: (b, n, 0))
        w_spec = pl.BlockSpec((TN, D_in, D_out), lambda n, b: (n, 0, 0))
        b_spec = pl.BlockSpec((TN, D_out), lambda n, b: (n, 0))
        o_spec = pl.BlockSpec((TB, TN, D_out), lambda n, b: (b, n, 0))
        semantics = ("parallel", "parallel")

    in_specs = [x_spec, w_spec]
    operands = [x, weight]
    if bias is not None:
        in_specs.append(b_spec)
        operands.append(bias)

    bytes_accessed = (x.size * x.dtype.itemsize
                      + weight.size * weight.dtype.itemsize
                      + (0 if bias is None else bias.size * bias.dtype.itemsize)
                      + B * N * D_out * np.dtype(out_dtype).itemsize)
    cost = pl.CostEstimate(flops=2 * B * N * D_in * D_out, transcendentals=0,
                           bytes_accessed=int(bytes_accessed))

    return pl.pallas_call(
        kernel,
        out_shape=jax.ShapeDtypeStruct((B, N, D_out), out_dtype),
        grid=grid,
        in_specs=in_specs,
        out_specs=o_spec,
        compiler_params=pltpu.CompilerParams(
            dimension_semantics=semantics,
            vmem_limit_bytes=_vmem_limit(footprint),
        ),
        cost_estimate=cost,
    )(*operands)


# ---------------------------------------------------------------------------
# public wrapper (matches the PyTorch _NLinear.forward semantics)
# ---------------------------------------------------------------------------
def nlinear(x, weight, bias=None, *, tile_b=1024, compute_dtype=None,
            out_dtype=None, use_fused=None, force_pallas=False):
    """out[b, n, :] = x[b, n, :] @ weight[n] + bias[n].

    x: (B, N, D_in), weight: (N, D_in, D_out), bias: (N, D_out) or None.
    """
    if x.ndim != 3:
        raise ValueError(
            "x must have a shape like (BATCH_SIZE, N_FEATURES, D_EMBEDDING)")
    B, N, D_in = x.shape
    assert weight.shape[:2] == (N, D_in), (weight.shape, x.shape)
    D_out = weight.shape[-1]
    if bias is not None:
        assert bias.shape == (N, D_out), (bias.shape, (N, D_out))
    if out_dtype is None:
        out_dtype = x.dtype

    # Optional streaming dtype.  NOT defaulted to bf16: converting an f32 `x`
    # here is an extra XLA pass over x (read 4B + write 2B + kernel read 2B
    # > 4B of streaming f32 directly), so bf16 streaming only pays off when the
    # caller already holds x/weight in bf16 (then no cast happens here).
    if compute_dtype is not None:
        x = x.astype(compute_dtype)
        weight = weight.astype(compute_dtype)

    # Tiny problems: a single fused XLA einsum beats any kernel launch.
    if not force_pallas and B * N * D_in * D_out < (1 << 16):
        out = jnp.einsum("bnd,ndo->bno", x, weight,
                         preferred_element_type=jnp.float32)
        if bias is not None:
            out = out + bias.astype(jnp.float32)[None]
        return out.astype(out_dtype)

    if use_fused is None:
        # The fused block-diagonal path wastes a factor N of MXU flops (free
        # while memory-bound) and N^2-scales the resident weight, so keep it to
        # genuinely small N.
        use_fused = N <= 16 and N * D_in <= 1024 and N * D_out <= 1024

    if use_fused:
        return _nlinear_fused(x, weight, bias, tile_b, out_dtype)
    return _nlinear_grouped(x, weight, bias, tile_b, out_dtype)


# ---------------------------------------------------------------------------
# self-test
# ---------------------------------------------------------------------------
if __name__ == "__main__":
    # Shapes consistent with (BATCH, N_FEATURES, D_EMBEDDING); B=200 / N=12
    # exercise ragged batch blocks, the >=2-batch-tile logic and unpadded
    # D_in=24 / D_out=40 trailing dims.
    B, N, D_in, D_out = 200, 12, 24, 40
    key = jax.random.PRNGKey(0)
    kx, kw, kb = jax.random.split(key, 3)

    # reset_parameters(): uniform(-d_in^-0.5, d_in^-0.5)
    d_in_rsqrt = D_in ** (-0.5)
    weight = jax.random.uniform(kw, (N, D_in, D_out), jnp.float32,
                                -d_in_rsqrt, d_in_rsqrt)
    bias = jax.random.uniform(kb, (N, D_out), jnp.float32,
                              -d_in_rsqrt, d_in_rsqrt)
    x = jax.random.normal(kx, (B, N, D_in), jnp.float32)

    ref = jnp.einsum("bnd,ndo->bno", x, weight) + bias[None, :, :]
    ref_nobias = jnp.einsum("bnd,ndo->bno", x, weight)

    # 1) default path (fused small-N block-diagonal matmul), f32 streaming.
    out = jax.block_until_ready(nlinear(x, weight, bias, force_pallas=True))
    assert out.shape == (B, N, D_out), out.shape
    assert jnp.allclose(out, ref, atol=1e-4, rtol=1e-4), (
        float(jnp.max(jnp.abs(out - ref))))

    # 2) general grouped path (what large-N / large-weight problems use).
    out_g = jax.block_until_ready(
        nlinear(x, weight, bias, use_fused=False, force_pallas=True))
    assert jnp.allclose(out_g, ref, atol=1e-4, rtol=1e-4), (
        float(jnp.max(jnp.abs(out_g - ref))))

    # 3) bf16-resident inputs (caller already keeps activations/weights in
    #    bf16): streams 2 B/elem, f32 accumulation, bf16 output.
    out_h = jax.block_until_ready(
        nlinear(x.astype(jnp.bfloat16), weight.astype(jnp.bfloat16),
                bias.astype(jnp.bfloat16), force_pallas=True))
    assert out_h.dtype == jnp.bfloat16
    assert jnp.allclose(out_h.astype(jnp.float32), ref, atol=3e-2, rtol=3e-2), (
        float(jnp.max(jnp.abs(out_h.astype(jnp.float32) - ref))))

    # 4) bias=None path (no bias stream / add at all).
    out_nb = jax.block_until_ready(nlinear(x, weight, None, force_pallas=True))
    assert jnp.allclose(out_nb, ref_nobias, atol=1e-4, rtol=1e-4), (
        float(jnp.max(jnp.abs(out_nb - ref_nobias))))

    print("KERNEL_OK")
</pallas_src>

<mosaic_0001>
module attributes {stable_mosaic.version = 11 : i64} {
  func.func @_fused_kernel_bias(%arg0: i32, %arg1: memref<112x288xf32, #tpu.memory_space<vmem>>, %arg2: memref<288x480xf32, #tpu.memory_space<vmem>>, %arg3: memref<1x480xf32, #tpu.memory_space<vmem>>, %arg4: memref<112x480xf32, #tpu.memory_space<vmem>>) attributes {dimension_semantics = [#tpu.dimension_semantics<parallel>], iteration_bounds = array<i64: 2>, scalar_prefetch = 0 : i64, scratch_operands = 0 : i64, tpu.core_type = #tpu.core_type<tc>, window_params = [{transform_indices = @transform_0, window_bounds = array<i64: 112, 288>}, {pipeline_mode = #tpu.pipeline_mode<synchronous>, transform_indices = @transform_1, window_bounds = array<i64: 288, 480>}, {pipeline_mode = #tpu.pipeline_mode<synchronous>, transform_indices = @transform_2, window_bounds = array<i64: 1, 480>}, {transform_indices = @transform_3, window_bounds = array<i64: 112, 480>}]} {
    %c0 = arith.constant 0 : index
    %c0_0 = arith.constant 0 : index
    %0 = vector.load %arg1[%c0, %c0_0] : memref<112x288xf32, #tpu.memory_space<vmem>>, vector<112x288xf32>
    %c0_1 = arith.constant 0 : index
    %c0_2 = arith.constant 0 : index
    %1 = vector.load %arg2[%c0_1, %c0_2] : memref<288x480xf32, #tpu.memory_space<vmem>>, vector<288x480xf32>
    %cst = arith.constant dense<0.000000e+00> : vector<112x480xf32>
    %2 = tpu.matmul %0, %1, %cst {dimension_numbers = #tpu.dot_dimension_numbers<[1], [0], [0], [1], [0, 0, 1, 1], [], []>} : vector<112x288xf32>, vector<288x480xf32>, vector<112x480xf32> -> vector<112x480xf32>
    %c0_3 = arith.constant 0 : index
    %c0_4 = arith.constant 0 : index
    %3 = vector.load %arg3[%c0_3, %c0_4] : memref<1x480xf32, #tpu.memory_space<vmem>>, vector<1x480xf32>
    %4 = vector.broadcast %3 : vector<1x480xf32> to vector<112x480xf32>
    %5 = arith.addf %2, %4 : vector<112x480xf32>
    %c0_5 = arith.constant 0 : index
    %c0_6 = arith.constant 0 : index
    %6 = vector.load %arg4[%c0_5, %c0_6] : memref<112x480xf32, #tpu.memory_space<vmem>>, vector<112x480xf32>
    tpu.vector_store %arg4[%c0_5, %c0_6], %5 {strides = array<i32>} : memref<112x480xf32, #tpu.memory_space<vmem>>, vector<112x480xf32>,
    return
  }
  func.func @transform_0(%arg0: i32) -> (i32, i32) {
    %c0_i32 = arith.constant 0 : i32
    %c0_i32_0 = arith.constant 0 : i32
    return %arg0, %c0_i32 : i32, i32
  }
  func.func @transform_1(%arg0: i32) -> (i32, i32) {
    %c0_i32 = arith.constant 0 : i32
    %c0_i32_0 = arith.constant 0 : i32
    %c0_i32_1 = arith.constant 0 : i32
    return %c0_i32, %c0_i32_0 : i32, i32
  }
  func.func @transform_2(%arg0: i32) -> (i32, i32) {
    %c0_i32 = arith.constant 0 : i32
    %c0_i32_0 = arith.constant 0 : i32
    %c0_i32_1 = arith.constant 0 : i32
    return %c0_i32, %c0_i32_0 : i32, i32
  }
  func.func @transform_3(%arg0: i32) -> (i32, i32) {
    %c0_i32 = arith.constant 0 : i32
    %c0_i32_0 = arith.constant 0 : i32
    return %arg0, %c0_i32 : i32, i32
  }
}

</mosaic_0001>

<bundles_post_ra>
// kernel: tpu_custom_call.1
= control target key start
LH: loop header
LB: loop body
LE: loop exit
PB: predicated region body
PF: predicated region fallthrough
CT: control target
= control target key end

     0   :  { %8 = vsyncpa [#allocation3], 0  ;;  %s2424_s0 = inlined_call_operand.vmem [shape: f32[200,288], index: 0, kind: input, shape index: {}]   ;;  %s2425_s1 = inlined_call_operand.vmem [shape: f32[288,480], index: 1, kind: input, shape index: {}]   ;;  %s2426_s2 = inlined_call_operand.vmem [shape: f32[1,480], index: 2, kind: input, shape index: {}]   ;;  %s2427_s3 = inlined_call_operand.hbm [shape: f32[200,480], index: 3, kind: output, shape index: {}]  }
   0x1   :  { %10 = vsyncpa [#allocation3 + $0x1], 0  ;;  %s1626_s12 = smov 0   ;;  %s1628_s13 = smov 0  }
   0x2   :  { %s1630_s14 = smov 0   ;;  %s1632_s15 = smov 0  }
   0x3 LB: > { %s1647_s16 = sadd.s32 4294967295, %s1600_s15   ;;  %s1193_s17 = sadd.s32 4294967294, %s1600_s15   ;;  %s1600_s15 = sphi %s1632_s15, %s2433_s15   ;;  %s1596_s14 = sphi %s1630_s14, %s2432_s14   ;;  %s1592_s13 = sphi %s1628_s13, %s2431_s13   ;;  %s1588_s12 = sphi %s1626_s12, %s2430_s12  }
   0x4   : > { %s1651_s18 = sadd.s32 1, %s1600_s15   ;;  %s91_s19 = sadd.s32 1, %s1596_s14 }
   0x5   : > { %s88_s20 = ssub.s32 %s1600_s15, %s1651_s18  ;;  %p101_p0 = scmp.ne.s32.totalorder %s1596_s14, %s1592_s13 }
   0x6   : > { %p89_p1 = scmp.eq.s32.totalorder %s88_s20, 0  ;;  %p102_p2 = scmp.eq.s32.totalorder %s1647_s16, 1 }
   0x7   : > { %p107_p3 = scmp.ne.s32.totalorder %s1592_s13, %s1588_s12  ;;  %p108_p4 = scmp.eq.s32.totalorder %s1193_s17, 1 }
   0x8   : > { %s1662_s21 = scalar_select %p89_p1, %s1596_s14, %s91_s19  }
   0x9   : > { %p1664_p5 = por %p102_p2, %p101_p0  ;;  %p1668_p6 = por %p108_p4, %p107_p3 }
   0xa   : > { %p1196_p7 = scmp.ge.s32.totalorder %s1600_s15, 1  ;;  %p152_p8 = scmp.lt.s32.totalorder %s1600_s15, 3 }
   0xc   : > { %p153_p9 = pnand %p1196_p7, %p152_p8 }
   0xd   : > { %v248_v0 = vld [vmem:[%s2425_s1 + $0x8] sm:$0xff] (!%p153_p9)  ;;  %v250_v2 = vld [vmem:[%s2425_s1 + $0x18] sm:$0xff] (!%p153_p9)  ;;  %v247_v5 = vld [vmem:[%s2425_s1] sm:$0xff] (!%p153_p9)  ;;  %s1855_s9 = smul.u32 (!%p153_p9), 14, %s1647_s16  ;;  %vm413_vm0 = vcmask (!%p153_p9), 261120   ;;  %s179_s28 = sand.u32 (!%p153_p9), 1, %s1592_s13  }
   0xe   : > { %156 = sbr.rel (%p153_p9) target bundleno = 434 (0x1b2), region = 32  ;;  %v252_v1 = vld [vmem:[%s2425_s1 + $0x28] sm:$0xff] (!%p153_p9)  ;;  %v254_v4 = vld [vmem:[%s2425_s1 + $0x38] sm:$0xff] (!%p153_p9)  ;;  %v251_v6 = vld [vmem:[%s2425_s1 + $0x20] sm:$0xff] (!%p153_p9)  ;;  %vm1055_vm1 = vcmask (!%p153_p9), 785408   ;;  %s2363_s5 = scalar_lea.sflag (!%p153_p9), [#allocation3], %s179_s28 }
   0xf   : > { %v1239_v3 = vpack.c.bf16 (!%p153_p9), %v252_v1, %v248_v0  ;;  %v1311_v7 = vpack.c.bf16 (!%p153_p9), %v254_v4, %v250_v2  ;;  %v1241_v8 = vpack.c.bf16 (!%p153_p9), %v251_v6, %v247_v5  ;;  %v249_v9 = vld [vmem:[%s2425_s1 + $0x10] sm:$0xff] (!%p153_p9)  ;;  %v256_v11 = vld [vmem:[%s2425_s1 + $0x48] sm:$0xff] (!%p153_p9)  ;;  %v258_v14 = vld [vmem:[%s2425_s1 + $0x58] sm:$0xff] (!%p153_p9)  ;;  %p188_p10 = scmp.lt.s32.totalorder (!%p153_p9), %s1855_s9, 24  ;;  %s1495_s4 = smul.u32 (!%p153_p9), 448, %s179_s28 }
  0x10   : > { %v253_v10 = vld [vmem:[%s2425_s1 + $0x30] sm:$0xff] (!%p153_p9)  ;;  %v260_v13 = vld [vmem:[%s2425_s1 + $0x68] sm:$0xff] (!%p153_p9)  ;;  %v262_v15 = vld [vmem:[%s2425_s1 + $0x78] sm:$0xff] (!%p153_p9) }
  0x11   : > { %1240 = vmatprep.subr.bf16.mxu0 (!%p153_p9), %v1239_v3  ;;  %v1313_v12 = vpack.c.bf16 (!%p153_p9), %v253_v10, %v249_v9  ;;  %1312 = vmatprep.subr.bf16.mxu1 (!%p153_p9), %v1311_v7  ;;  %v1243_v16 = vpack.c.bf16 (!%p153_p9), %v260_v13, %v256_v11  ;;  %v1315_v17 = vpack.c.bf16 (!%p153_p9), %v262_v15, %v258_v14  ;;  %v255_v18 = vld [vmem:[%s2425_s1 + $0x40] sm:$0xff] (!%p153_p9)  ;;  %v257_v20 = vld [vmem:[%s2425_s1 + $0x50] sm:$0xff] (!%p153_p9)  ;;  %v264_v23 = vld [vmem:[%s2425_s1 + $0x88] sm:$0xff] (!%p153_p9) }
  0x12   : > { %1242 = vmatpush1.bf16.msra.mxu0 (!%p153_p9), %v1241_v8  ;;  %v259_v19 = vld [vmem:[%s2425_s1 + $0x60] sm:$0xff] (!%p153_p9)  ;;  %v261_v22 = vld [vmem:[%s2425_s1 + $0x70] sm:$0xff] (!%p153_p9)  ;;  %v268_v24 = vld [vmem:[%s2425_s1 + $0xa8] sm:$0xff] (!%p153_p9) }
  0x13   : > { %1314 = vmatpush1.bf16.msra.mxu1 (!%p153_p9), %v1313_v12  ;;  %v1245_v21 = vpack.c.bf16 (!%p153_p9), %v259_v19, %v255_v18  ;;  %1244 = vmatprep.subr.bf16.mxu0 (!%p153_p9), %v1243_v16  ;;  %v1317_v25 = vpack.c.bf16 (!%p153_p9), %v261_v22, %v257_v20  ;;  %v1247_v26 = vpack.c.bf16 (!%p153_p9), %v268_v24, %v264_v23  ;;  %v266_v27 = vld [vmem:[%s2425_s1 + $0x98] sm:$0xff] (!%p153_p9)  ;;  %v263_v29 = vld [vmem:[%s2425_s1 + $0x80] sm:$0xff] (!%p153_p9)  ;;  %v265_v32 = vld [vmem:[%s2425_s1 + $0x90] sm:$0xff] (!%p153_p9) }
  0x14   : > { %1316 = vmatprep.subr.bf16.mxu1 (!%p153_p9), %v1315_v17  ;;  %v270_v28 = vld [vmem:[%s2425_s1 + $0xb8] sm:$0xff] (!%p153_p9)  ;;  %v267_v31 = vld [vmem:[%s2425_s1 + $0xa0] sm:$0xff] (!%p153_p9)  ;;  %v269_v33 = vld [vmem:[%s2425_s1 + $0xb0] sm:$0xff] (!%p153_p9) }
  0x15   : > { %v1319_v30 = vpack.c.bf16 %v270_v28, %v266_v27  ;;  %v1249_v34 = vpack.c.bf16 %v267_v31, %v263_v29  ;;  %v272_v35 = vld [vmem:[%s2425_s1 + $0xc8] sm:$0xff]  ;;  %v274_v37 = vld [vmem:[%s2425_s1 + $0xd8] sm:$0xff]  ;;  %v1321_v38 = vpack.c.bf16 %v269_v33, %v265_v32  ;;  %v271_v41 = vld [vmem:[%s2425_s1 + $0xc0] sm:$0xff]  ;;  %s1909_s7 = scalar_select %p188_p10, %s1855_s9, 24 }
  0x16   : > { %1246 = vmatpush1.bf16.msra.mxu0 %v1245_v21  ;;  %v276_v36 = vld [vmem:[%s2425_s1 + $0xe8] sm:$0xff]  ;;  %v278_v40 = vld [vmem:[%s2425_s1 + $0xf8] sm:$0xff]  ;;  %v275_v42 = vld [vmem:[%s2425_s1 + $0xe0] sm:$0xff]  ;;  %s1118_s6 = ssub.s32 (%p1664_p5), 25, %s1855_s9 }
  0x17   : > { %1318 = vmatpush1.bf16.msra.mxu1 %v1317_v25  ;;  %1248 = vmatprep.subr.bf16.mxu0 %v1247_v26  ;;  %v1251_v39 = vpack.c.bf16 %v276_v36, %v272_v35  ;;  %v1323_v43 = vpack.c.bf16 %v278_v40, %v274_v37  ;;  %v273_v44 = vld [vmem:[%s2425_s1 + $0xd0] sm:$0xff]  ;;  %v280_v46 = vld [vmem:[%s2425_s1 + $0x108] sm:$0xff]  ;;  %v282_v48 = vld [vmem:[%s2425_s1 + $0x118] sm:$0xff]  ;;  %v1253_v50 = vpack.c.bf16 %v275_v42, %v271_v41  ;;  %s1496_s8 = smul.u32 24, %s1909_s7  ;;  %p1119_p11 = scmp.lt.s32.totalorder (%p1664_p5), %s1118_s6, 14 }
  0x18   : > { %1320 = vmatprep.subr.bf16.mxu1 %v1319_v30  ;;  %v277_v45 = vld [vmem:[%s2425_s1 + $0xf0] sm:$0xff]  ;;  %v284_v47 = vld [vmem:[%s2425_s1 + $0x128] sm:$0xff]  ;;  %v286_v49 = vld [vmem:[%s2425_s1 + $0x138] sm:$0xff] }
  0x19   : > { %v1325_v51 = vpack.c.bf16 %v277_v45, %v273_v44  ;;  %v1255_v52 = vpack.c.bf16 %v284_v47, %v280_v46  ;;  %v279_v53 = vld [vmem:[%s2425_s1 + $0x100] sm:$0xff]  ;;  %v281_v55 = vld [vmem:[%s2425_s1 + $0x110] sm:$0xff]  ;;  %v1327_v56 = vpack.c.bf16 %v286_v49, %v282_v48  ;;  %v288_v58 = vld [vmem:[%s2425_s1 + $0x148] sm:$0xff]  ;;  %s1963_s17 = scalar_lea.vmem %s2424_s0, %s1496_s8 }
  0x1a   : > { %1250 = vmatpush1.bf16.msra.mxu0 %v1249_v34  ;;  %v283_v54 = vld [vmem:[%s2425_s1 + $0x120] sm:$0xff]  ;;  %v285_v57 = vld [vmem:[%s2425_s1 + $0x130] sm:$0xff]  ;;  %v292_v59 = vld [vmem:[%s2425_s1 + $0x168] sm:$0xff] }
  0x1b   : > { %1322 = vmatpush1.bf16.msra.mxu1 %v1321_v38  ;;  %1252 = vmatprep.subr.bf16.mxu0 %v1251_v39  ;;  %v290_v60 = vld [vmem:[%s2425_s1 + $0x158] sm:$0xff]  ;;  %v1257_v62 = vpack.c.bf16 %v283_v54, %v279_v53  ;;  %v1329_v63 = vpack.c.bf16 %v285_v57, %v281_v55  ;;  %v1259_v0 = vpack.c.bf16 %v292_v59, %v288_v58  ;;  %v287_v1 = vld [vmem:[%s2425_s1 + $0x140] sm:$0xff]  ;;  %v289_v3 = vld [vmem:[%s2425_s1 + $0x150] sm:$0xff] }
  0x1c   : > { %1324 = vmatprep.subr.bf16.mxu1 %v1323_v43  ;;  %v294_v61 = vld [vmem:[%s2425_s1 + $0x178] sm:$0xff]  ;;  %v291_v2 = vld [vmem:[%s2425_s1 + $0x160] sm:$0xff]  ;;  %v293_v5 = vld [vmem:[%s2425_s1 + $0x170] sm:$0xff] }
  0x1d   : > { %v1331_v4 = vpack.c.bf16 %v294_v61, %v290_v60  ;;  %v296_v6 = vld [vmem:[%s2425_s1 + $0x188] sm:$0xff]  ;;  %v298_v8 = vld [vmem:[%s2425_s1 + $0x198] sm:$0xff]  ;;  %v1261_v10 = vpack.c.bf16 %v291_v2, %v287_v1  ;;  %v1333_v11 = vpack.c.bf16 %v293_v5, %v289_v3  ;;  %v295_v13 = vld [vmem:[%s2425_s1 + $0x180] sm:$0xff] }
  0x1e   : > { %1254 = vmatpush1.bf16.msra.mxu0 %v1253_v50  ;;  %v300_v7 = vld [vmem:[%s2425_s1 + $0x1a8] sm:$0xff]  ;;  %v302_v9 = vld [vmem:[%s2425_s1 + $0x1b8] sm:$0xff]  ;;  %v299_v14 = vld [vmem:[%s2425_s1 + $0x1a0] sm:$0xff] }
  0x1f   : > { %1326 = vmatpush1.bf16.msra.mxu1 %v1325_v51  ;;  %1256 = vmatprep.subr.bf16.mxu0 %v1255_v52  ;;  %v1263_v12 = vpack.c.bf16 %v300_v7, %v296_v6  ;;  %v297_v15 = vld [vmem:[%s2425_s1 + $0x190] sm:$0xff]  ;;  %v1335_v16 = vpack.c.bf16 %v302_v9, %v298_v8  ;;  %v304_v18 = vld [vmem:[%s2425_s1 + $0x1c8] sm:$0xff]  ;;  %v306_v20 = vld [vmem:[%s2425_s1 + $0x1d8] sm:$0xff]  ;;  %v1265_v22 = vpack.c.bf16 %v299_v14, %v295_v13 }
  0x20   : > { %1328 = vmatprep.subr.bf16.mxu1 %v1327_v56  ;;  %v301_v17 = vld [vmem:[%s2425_s1 + $0x1b0] sm:$0xff]  ;;  %v308_v19 = vld [vmem:[%s2425_s1 + $0x1e8] sm:$0xff]  ;;  %v310_v21 = vld [vmem:[%s2425_s1 + $0x1f8] sm:$0xff] }
  0x21   : > { %v1337_v23 = vpack.c.bf16 %v301_v17, %v297_v15  ;;  %v1267_v24 = vpack.c.bf16 %v308_v19, %v304_v18  ;;  %v303_v25 = vld [vmem:[%s2425_s1 + $0x1c0] sm:$0xff]  ;;  %v305_v27 = vld [vmem:[%s2425_s1 + $0x1d0] sm:$0xff]  ;;  %v1339_v28 = vpack.c.bf16 %v310_v21, %v306_v20  ;;  %v312_v30 = vld [vmem:[%s2425_s1 + $0x208] sm:$0xff] }
  0x22   : > { %1258 = vmatpush1.bf16.msra.mxu0 %v1257_v62  ;;  %v307_v26 = vld [vmem:[%s2425_s1 + $0x1e0] sm:$0xff]  ;;  %v309_v29 = vld [vmem:[%s2425_s1 + $0x1f0] sm:$0xff]  ;;  %v316_v31 = vld [vmem:[%s2425_s1 + $0x228] sm:$0xff] }
  0x23   : > { %1330 = vmatpush1.bf16.msra.mxu1 %v1329_v63  ;;  %1260 = vmatprep.subr.bf16.mxu0 %v1259_v0  ;;  %v314_v32 = vld [vmem:[%s2425_s1 + $0x218] sm:$0xff]  ;;  %v1269_v34 = vpack.c.bf16 %v307_v26, %v303_v25  ;;  %v1341_v35 = vpack.c.bf16 %v309_v29, %v305_v27  ;;  %v1271_v36 = vpack.c.bf16 %v316_v31, %v312_v30  ;;  %v311_v37 = vld [vmem:[%s2425_s1 + $0x200] sm:$0xff]  ;;  %v313_v39 = vld [vmem:[%s2425_s1 + $0x210] sm:$0xff] }
  0x24   : > { %1332 = vmatprep.subr.bf16.mxu1 %v1331_v4  ;;  %v318_v33 = vld [vmem:[%s2425_s1 + $0x238] sm:$0xff]  ;;  %v315_v38 = vld [vmem:[%s2425_s1 + $0x220] sm:$0xff]  ;;  %v317_v41 = vld [vmem:[%s2425_s1 + $0x230] sm:$0xff] }
  0x25   : > { %v1343_v40 = vpack.c.bf16 %v318_v33, %v314_v32  ;;  %v320_v42 = vld [vmem:[%s2425_s1 + $0x248] sm:$0xff]  ;;  %v322_v44 = vld [vmem:[%s2425_s1 + $0x258] sm:$0xff]  ;;  %v1273_v46 = vpack.c.bf16 %v315_v38, %v311_v37  ;;  %v1345_v47 = vpack.c.bf16 %v317_v41, %v313_v39  ;;  %v319_v49 = vld [vmem:[%s2425_s1 + $0x240] sm:$0xff] }
  0x26   : > { %1262 = vmatpush1.bf16.msra.mxu0 %v1261_v10  ;;  %v324_v43 = vld [vmem:[%s2425_s1 + $0x268] sm:$0xff]  ;;  %v326_v45 = vld [vmem:[%s2425_s1 + $0x278] sm:$0xff]  ;;  %v323_v50 = vld [vmem:[%s2425_s1 + $0x260] sm:$0xff] }
  0x27   : > { %1334 = vmatpush1.bf16.msra.mxu1 %v1333_v11  ;;  %1264 = vmatprep.subr.bf16.mxu0 %v1263_v12  ;;  %v1275_v48 = vpack.c.bf16 %v324_v43, %v320_v42  ;;  %v321_v51 = vld [vmem:[%s2425_s1 + $0x250] sm:$0xff]  ;;  %v1347_v52 = vpack.c.bf16 %v326_v45, %v322_v44  ;;  %v328_v54 = vld [vmem:[%s2425_s1 + $0x288] sm:$0xff]  ;;  %v330_v56 = vld [vmem:[%s2425_s1 + $0x298] sm:$0xff]  ;;  %v1277_v58 = vpack.c.bf16 %v323_v50, %v319_v49 }
  0x28   : > { %1336 = vmatprep.subr.bf16.mxu1 %v1335_v16  ;;  %v325_v53 = vld [vmem:[%s2425_s1 + $0x270] sm:$0xff]  ;;  %v332_v55 = vld [vmem:[%s2425_s1 + $0x2a8] sm:$0xff]  ;;  %v334_v57 = vld [vmem:[%s2425_s1 + $0x2b8] sm:$0xff] }
  0x29   : > { %v1349_v59 = vpack.c.bf16 %v325_v53, %v321_v51  ;;  %v1279_v60 = vpack.c.bf16 %v332_v55, %v328_v54  ;;  %v327_v61 = vld [vmem:[%s2425_s1 + $0x280] sm:$0xff]  ;;  %v329_v63 = vld [vmem:[%s2425_s1 + $0x290] sm:$0xff]  ;;  %v1351_v0 = vpack.c.bf16 %v334_v57, %v330_v56  ;;  %v336_v2 = vld [vmem:[%s2425_s1 + $0x2c8] sm:$0xff] }
  0x2a   : > { %1266 = vmatpush1.bf16.msra.mxu0 %v1265_v22  ;;  %v331_v62 = vld [vmem:[%s2425_s1 + $0x2a0] sm:$0xff]  ;;  %v333_v1 = vld [vmem:[%s2425_s1 + $0x2b0] sm:$0xff]  ;;  %v340_v3 = vld [vmem:[%s2425_s1 + $0x2e8] sm:$0xff] }
  0x2b   : > { %1338 = vmatpush1.bf16.msra.mxu1 %v1337_v23  ;;  %1268 = vmatprep.subr.bf16.mxu0 %v1267_v24  ;;  %v338_v4 = vld [vmem:[%s2425_s1 + $0x2d8] sm:$0xff]  ;;  %v1281_v6 = vpack.c.bf16 %v331_v62, %v327_v61  ;;  %v335_v7 = vld [vmem:[%s2425_s1 + $0x2c0] sm:$0xff]  ;;  %v1353_v8 = vpack.c.bf16 %v333_v1, %v329_v63  ;;  %v1283_v9 = vpack.c.bf16 %v340_v3, %v336_v2  ;;  %v337_v11 = vld [vmem:[%s2425_s1 + $0x2d0] sm:$0xff] }
  0x2c   : > { %1340 = vmatprep.subr.bf16.mxu1 %v1339_v28  ;;  %v342_v5 = vld [vmem:[%s2425_s1 + $0x2f8] sm:$0xff]  ;;  %v339_v10 = vld [vmem:[%s2425_s1 + $0x2e0] sm:$0xff]  ;;  %v341_v12 = vld [vmem:[%s2425_s1 + $0x2f0] sm:$0xff] }
  0x2d   : > { %v1355_v13 = vpack.c.bf16 %v342_v5, %v338_v4  ;;  %v344_v14 = vld [vmem:[%s2425_s1 + $0x308] sm:$0xff]  ;;  %v346_v17 = vld [vmem:[%s2425_s1 + $0x318] sm:$0xff]  ;;  %v1285_v19 = vpack.c.bf16 %v339_v10, %v335_v7  ;;  %v1357_v20 = vpack.c.bf16 %v341_v12, %v337_v11  ;;  %v343_v22 = vld [vmem:[%s2425_s1 + $0x300] sm:$0xff] }
  0x2e   : > { %1270 = vmatpush1.bf16.msra.mxu0 %v1269_v34  ;;  %v348_v15 = vld [vmem:[%s2425_s1 + $0x328] sm:$0xff]  ;;  %v350_v18 = vld [vmem:[%s2425_s1 + $0x338] sm:$0xff]  ;;  %v347_v23 = vld [vmem:[%s2425_s1 + $0x320] sm:$0xff] }
  0x2f   : > { %1342 = vmatpush1.bf16.msra.mxu1 %v1341_v35  ;;  %1272 = vmatprep.subr.bf16.mxu0 %v1271_v36  ;;  %v206_v16 = vld [vmem:[%s1963_s17 + $0x8] sm:$0xff]  ;;  %v1287_v21 = vpack.c.bf16 %v348_v15, %v344_v14  ;;  %v345_v24 = vld [vmem:[%s2425_s1 + $0x310] sm:$0xff]  ;;  %v1359_v25 = vpack.c.bf16 %v350_v18, %v346_v17  ;;  %v354_v29 = vld [vmem:[%s2425_s1 + $0x358] sm:$0xff]  ;;  %v1289_v31 = vpack.c.bf16 %v347_v23, %v343_v22 }
  0x30   : > { %1344 = vmatprep.subr.bf16.mxu1 %v1343_v40  ;;  %520 = vmatprep.mubr.f32.mxu0 %v206_v16  ;;  %v349_v26 = vld [vmem:[%s2425_s1 + $0x330] sm:$0xff]  ;;  %v352_v27 = vld [vmem:[%s2425_s1 + $0x348] sm:$0xff]  ;;  %v358_v30 = vld [vmem:[%s2425_s1 + $0x378] sm:$0xff] }
  0x31   : > { %818 = vmatprep.mubr.f32.mxu1 %v206_v16  ;;  %v356_v28 = vld [vmem:[%s2425_s1 + $0x368] sm:$0xff]  ;;  %v1361_v32 = vpack.c.bf16 %v349_v26, %v345_v24  ;;  %v351_v34 = vld [vmem:[%s2425_s1 + $0x340] sm:$0xff]  ;;  %v353_v36 = vld [vmem:[%s2425_s1 + $0x350] sm:$0xff]  ;;  %v1363_v37 = vpack.c.bf16 %v358_v30, %v354_v29 }
  0x32   : > { %1274 = vmatpush1.bf16.msra.mxu0 %v1273_v46  ;;  %v1291_v33 = vpack.c.bf16 %v356_v28, %v352_v27  ;;  %v355_v35 = vld [vmem:[%s2425_s1 + $0x360] sm:$0xff]  ;;  %v357_v38 = vld [vmem:[%s2425_s1 + $0x370] sm:$0xff]  ;;  %v360_v39 = vld [vmem:[%s2425_s1 + $0x388] sm:$0xff] }
  0x33   : > { %1346 = vmatpush1.bf16.msra.mxu1 %v1345_v47  ;;  %1276 = vmatprep.subr.bf16.mxu0 %v1275_v48  ;;  %v364_v40 = vld [vmem:[%s2425_s1 + $0x3a8] sm:$0xff]  ;;  %v362_v41 = vld [vmem:[%s2425_s1 + $0x398] sm:$0xff]  ;;  %v1293_v43 = vpack.c.bf16 %v355_v35, %v351_v34  ;;  %v1365_v44 = vpack.c.bf16 %v357_v38, %v353_v36  ;;  %v359_v46 = vld [vmem:[%s2425_s1 + $0x380] sm:$0xff] }
  0x34   : > { %1348 = vmatprep.subr.bf16.mxu1 %v1347_v52  ;;  %v366_v42 = vld [vmem:[%s2425_s1 + $0x3b8] sm:$0xff]  ;;  %v1295_v45 = vpack.c.bf16 %v364_v40, %v360_v39  ;;  %v363_v47 = vld [vmem:[%s2425_s1 + $0x3a0] sm:$0xff]  ;;  %v361_v48 = vld [vmem:[%s2425_s1 + $0x390] sm:$0xff] }
  0x35   : > { %v1367_v49 = vpack.c.bf16 %v366_v42, %v362_v41  ;;  %v365_v50 = vld [vmem:[%s2425_s1 + $0x3b0] sm:$0xff]  ;;  %v368_v51 = vld [vmem:[%s2425_s1 + $0x3c8] sm:$0xff]  ;;  %v370_v53 = vld [vmem:[%s2425_s1 + $0x3d8] sm:$0xff]  ;;  %v1297_v55 = vpack.c.bf16 %v363_v47, %v359_v46 }
  0x36   : > { %1278 = vmatpush1.bf16.msra.mxu0 %v1277_v58  ;;  %v372_v52 = vld [vmem:[%s2425_s1 + $0x3e8] sm:$0xff]  ;;  %v374_v54 = vld [vmem:[%s2425_s1 + $0x3f8] sm:$0xff]  ;;  %v1369_v56 = vpack.c.bf16 %v365_v50, %v361_v48  ;;  %v367_v58 = vld [vmem:[%s2425_s1 + $0x3c0] sm:$0xff] }
  0x37   : > { %1350 = vmatpush1.bf16.msra.mxu1 %v1349_v59  ;;  %1280 = vmatprep.subr.bf16.mxu0 %v1279_v60  ;;  %v1299_v57 = vpack.c.bf16 %v372_v52, %v368_v51  ;;  %v371_v59 = vld [vmem:[%s2425_s1 + $0x3e0] sm:$0xff]  ;;  %v369_v60 = vld [vmem:[%s2425_s1 + $0x3d0] sm:$0xff]  ;;  %v1371_v61 = vpack.c.bf16 %v374_v54, %v370_v53  ;;  %v376_v63 = vld [vmem:[%s2425_s1 + $0x408] sm:$0xff]  ;;  %v1602_v52 = vmov 0.0  }
  0x38   : > { %1352 = vmatprep.subr.bf16.mxu1 %v1351_v0  ;;  %v373_v62 = vld [vmem:[%s2425_s1 + $0x3f0] sm:$0xff]  ;;  %v380_v0 = vld [vmem:[%s2425_s1 + $0x428] sm:$0xff]  ;;  %v378_v1 = vld [vmem:[%s2425_s1 + $0x418] sm:$0xff]  ;;  %v1301_v3 = vpack.c.bf16 %v371_v59, %v367_v58 }
  0x39   : > { %v382_v2 = vld [vmem:[%s2425_s1 + $0x438] sm:$0xff]  ;;  %v1373_v4 = vpack.c.bf16 %v373_v62, %v369_v60  ;;  %v1303_v5 = vpack.c.bf16 %v380_v0, %v376_v63  ;;  %v379_v7 = vld [vmem:[%s2425_s1 + $0x420] sm:$0xff]  ;;  %v381_v10 = vld [vmem:[%s2425_s1 + $0x430] sm:$0xff] }
  0x3a   : > { %1282 = vmatpush1.bf16.msra.mxu0 %v1281_v6  ;;  %v375_v6 = vld [vmem:[%s2425_s1 + $0x400] sm:$0xff]  ;;  %v384_v11 = vld [vmem:[%s2425_s1 + $0x448] sm:$0xff]  ;;  %v386_v15 = vld [vmem:[%s2425_s1 + $0x458] sm:$0xff] }
  0x3b   : > { %1354 = vmatpush1.bf16.msra.mxu1 %v1353_v8  ;;  %1284 = vmatprep.subr.bf16.mxu0 %v1283_v9  ;;  %v1375_v8 = vpack.c.bf16 %v382_v2, %v378_v1  ;;  %v377_v9 = vld [vmem:[%s2425_s1 + $0x410] sm:$0xff]  ;;  %v388_v12 = vld [vmem:[%s2425_s1 + $0x468] sm:$0xff]  ;;  %v1305_v14 = vpack.c.bf16 %v379_v7, %v375_v6  ;;  %v390_v16 = vld [vmem:[%s2425_s1 + $0x478] sm:$0xff] }
  0x3c   : > { %1356 = vmatprep.subr.bf16.mxu1 %v1355_v13  ;;  %v205_v13 = vld [vmem:[%s1963_s17] sm:$0xff]  ;;  %v1377_v17 = vpack.c.bf16 %v381_v10, %v377_v9  ;;  %v1379_v22 = vpack.c.bf16 %v390_v16, %v386_v15  ;;  %v385_v23 = vld [vmem:[%s2425_s1 + $0x450] sm:$0xff]  ;;  %v212_v26 = vld [vmem:[%s1963_s17 + $0x38] sm:$0xff] }
  0x3d   : > { %v209_v18 = vld [vmem:[%s1963_s17 + $0x20] sm:$0xff]  ;;  %v389_v24 = vld [vmem:[%s2425_s1 + $0x470] sm:$0xff]  ;;  %v220_v35 = vld [vmem:[%s1963_s17 + $0x78] sm:$0xff] }
  0x3e   : > { %1286 = vmatpush1.bf16.msra.mxu0 %v1285_v19  ;;  %v1307_v19 = vpack.c.bf16 %v388_v12, %v384_v11  ;;  %v1381_v28 = vpack.c.bf16 %v389_v24, %v385_v23  ;;  %v211_v29 = vld [vmem:[%s1963_s17 + $0x30] sm:$0xff]  ;;  %v221_v34 = vld [vmem:[%s1963_s17 + $0x80] sm:$0xff]  ;;  %v224_v36 = vld [vmem:[%s1963_s17 + $0x98] sm:$0xff] }
  0x3f   : > { %1358 = vmatpush1.bf16.msra.mxu1 %v1357_v20  ;;  %1288 = vmatprep.subr.bf16.mxu0 %v1287_v21  ;;  %v383_v20 = vld [vmem:[%s2425_s1 + $0x440] sm:$0xff]  ;;  %v215_v30 = vld [vmem:[%s1963_s17 + $0x50] sm:$0xff]  ;;  %v226_v39 = vld [vmem:[%s1963_s17 + $0xa8] sm:$0xff] }
  0x40   : > { %1360 = vmatprep.subr.bf16.mxu1 %v1359_v25  ;;  %v387_v21 = vld [vmem:[%s2425_s1 + $0x460] sm:$0xff]  ;;  %v208_v25 = vld [vmem:[%s1963_s17 + $0x18] sm:$0xff]  ;;  %v227_v38 = vld [vmem:[%s1963_s17 + $0xb0] sm:$0xff] }
  0x41   : > { %v1309_v27 = vpack.c.bf16 %v387_v21, %v383_v20  ;;  %v230_v40 = vld [vmem:[%s1963_s17 + $0xc8] sm:$0xff]  ;;  %v229_v41 = vld [vmem:[%s1963_s17 + $0xc0] sm:$0xff]  ;;  %v239_v46 = vld [vmem:[%s1963_s17 + $0x110] sm:$0xff] }
  0x42   : > { %1290 = vmatpush1.bf16.msra.mxu0 %v1289_v31  ;;  %v214_v31 = vld [vmem:[%s1963_s17 + $0x48] sm:$0xff]  ;;  %v233_v42 = vld [vmem:[%s1963_s17 + $0xe0] sm:$0xff]  ;;  %v244_v51 = vld [vmem:[%s1963_s17 + $0x138] sm:$0xff] }
  0x43   : > { %1362 = vmatpush1.bf16.msra.mxu1 %v1361_v32  ;;  %1292 = vmatprep.subr.bf16.mxu0 %v1291_v33  ;;  %v218_v32 = vld [vmem:[%s1963_s17 + $0x68] sm:$0xff]  ;;  %v217_v33 = vld [vmem:[%s1963_s17 + $0x60] sm:$0xff]  ;;  %v207_v53 = vld [vmem:[%s1963_s17 + $0x10] sm:$0xff] }
  0x44   : > { %1364 = vmatprep.subr.bf16.mxu1 %v1363_v37  ;;  %v223_v37 = vld [vmem:[%s1963_s17 + $0x90] sm:$0xff]  ;;  %v238_v47 = vld [vmem:[%s1963_s17 + $0x108] sm:$0xff]  ;;  %v245_v50 = vld [vmem:[%s1963_s17 + $0x140] sm:$0xff] }
  0x45   : > { %v242_v48 = vld [vmem:[%s1963_s17 + $0x128] sm:$0xff]  ;;  %v225_v59 = vld [vmem:[%s1963_s17 + $0xa0] sm:$0xff]  ;;  %v228_v60 = vld [vmem:[%s1963_s17 + $0xb8] sm:$0xff] }
  0x46   : > { %1294 = vmatpush1.bf16.msra.mxu0 %v1293_v43  ;;  %v232_v43 = vld [vmem:[%s1963_s17 + $0xd8] sm:$0xff]  ;;  %v210_v54 = vld [vmem:[%s1963_s17 + $0x28] sm:$0xff]  ;;  %v237_v63 = vld [vmem:[%s1963_s17 + $0x100] sm:$0xff] }
  0x47   : > { %1366 = vmatpush1.bf16.msra.mxu1 %v1365_v44  ;;  %1296 = vmatprep.subr.bf16.mxu0 %v1295_v45  ;;  %v236_v44 = vld [vmem:[%s1963_s17 + $0xf8] sm:$0xff]  ;;  %v235_v45 = vld [vmem:[%s1963_s17 + $0xf0] sm:$0xff]  ;;  %v222_v58 = vld [vmem:[%s1963_s17 + $0x88] sm:$0xff] }
  0x48   : > { %1368 = vmatprep.subr.bf16.mxu1 %v1367_v49  ;;  %v241_v49 = vld [vmem:[%s1963_s17 + $0x120] sm:$0xff]  ;;  %v234_v62 = vld [vmem:[%s1963_s17 + $0xe8] sm:$0xff]  ;;  %v240_v0 = vld [vmem:[%s1963_s17 + $0x118] sm:$0xff] }
  0x49   : > { %v243_v1 = vld [vmem:[%s1963_s17 + $0x130] sm:$0xff]  ;;  %v246_v2 = vld [vmem:[%s1963_s17 + $0x148] sm:$0xff]  ;;  %v391_v6 = vld [vmem:[%s2426_s2] sm:$0xf] }
  0x4a   : > { %1298 = vmatpush1.bf16.msra.mxu0 %v1297_v55  ;;  %v213_v55 = vld [vmem:[%s1963_s17 + $0x40] sm:$0xff] }
  0x4b   : > { %1370 = vmatpush1.bf16.msra.mxu1 %v1369_v56  ;;  %1300 = vmatprep.subr.bf16.mxu0 %v1299_v57  ;;  %v216_v56 = vld [vmem:[%s1963_s17 + $0x58] sm:$0xff]  ;;  %v219_v57 = vld [vmem:[%s1963_s17 + $0x70] sm:$0xff] }
  0x4c   : > { %1372 = vmatprep.subr.bf16.mxu1 %v1371_v61  ;;  %v231_v61 = vld [vmem:[%s1963_s17 + $0xd0] sm:$0xff]  ;;  %s2236_s17 = scalar_lea.vmem [#allocation2], %s1495_s4 }
  0x4e   : > { %1302 = vmatpush1.bf16.msra.mxu0 %v1301_v3  ;;  %v393_v3 = vlaneseq }
  0x4f   : > { %1374 = vmatpush1.bf16.msra.mxu1 %v1373_v4  ;;  %1304 = vmatprep.subr.bf16.mxu0 %v1303_v5 }
  0x50   : > { %1376 = vmatprep.subr.bf16.mxu1 %v1375_v8  ;;  %v394_v4 = vshrl.u32 %v393_v3, 7 }
  0x51   : > { %521 = vmatmul.mubr.f32.vlgmr.msra.gmra.mrb[0].mxu0 %v205_v13 }
  0x52   : > { %819 = vmatmul.mubr.f32.vlgmr.msra.gmra.mrb[0].mxu1 %v205_v13  ;;  %1306 = vmatpush1.bf16.msra.mxu0 %v1305_v14  ;;  %v395_v5 = vsub.s32 0, %v394_v4  ;;  %v403_v7 = vsub.s32 2, %v394_v4  ;;  %v399_v8 = vsub.s32 1, %v394_v4  ;;  %v407_v9 = vsub.s32 3, %v394_v4 }
  0x53   : > { %1378 = vmatpush1.bf16.msra.mxu1 %v1377_v17  ;;  %526 = vmatprep.mubr.f32.mxu0 %v209_v18 }
  0x54   : > { %824 = vmatprep.mubr.f32.mxu1 %v209_v18  ;;  %1308 = vmatprep.subr.bf16.mxu0 %v1307_v19  ;;  %v2225_v10 = vrot.slane %v391_v6, %v395_v5  ;;  %v2227_v11 = vrot.slane %v391_v6, %v403_v7  ;;  %v2229_v12 = vrot.slane %v391_v6, %v399_v8 }
  0x55   : > { %527 = vmatmul.mubr.f32.gmra.mrb[2].mxu0 %v208_v25  ;;  %1380 = vmatprep.subr.bf16.mxu1 %v1379_v22  ;;  %v2231_v13 = vrot.slane %v391_v6, %v407_v9 }
  0x56   : > { %825 = vmatmul.mubr.f32.gmra.mrb[2].mxu1 %v208_v25  ;;  %532 = vmatprep.mubr.f32.mxu0 %v212_v26 }
  0x57   : > { %830 = vmatprep.mubr.f32.mxu1 %v212_v26  ;;  %1310 = vmatpush1.bf16.msra.mxu0 %v1309_v27 }
  0x58   : > { %1382 = vmatpush1.bf16.msra.mxu1 %v1381_v28 }
  0x59   : > { %533 = vmatmul.mubr.f32.gmra.mrb[4].mxu0 %v211_v29 }
  0x5a   : > { %831 = vmatmul.mubr.f32.gmra.mrb[4].mxu1 %v211_v29  ;;  %538 = vmatprep.mubr.f32.mxu0 %v215_v30 }
  0x5b   : > { %836 = vmatprep.mubr.f32.mxu1 %v215_v30 }
  0x5d   : > { %539 = vmatmul.mubr.f32.gmra.mrb[6].mxu0 %v214_v31 }
  0x5e   : > { %837 = vmatmul.mubr.f32.gmra.mrb[6].mxu1 %v214_v31  ;;  %544 = vmatprep.mubr.f32.mxu0 %v218_v32 }
  0x5f   : > { %842 = vmatprep.mubr.f32.mxu1 %v218_v32 }
  0x61   : > { %545 = vmatmul.mubr.f32.gmra.mrb[8].mxu0 %v217_v33 }
  0x62   : > { %843 = vmatmul.mubr.f32.gmra.mrb[8].mxu1 %v217_v33  ;;  %550 = vmatprep.mubr.f32.mxu0 %v221_v34 }
  0x63   : > { %848 = vmatprep.mubr.f32.mxu1 %v221_v34 }
  0x65   : > { %551 = vmatmul.mubr.f32.gmra.mrb[10].mxu0 %v220_v35 }
  0x66   : > { %849 = vmatmul.mubr.f32.gmra.mrb[10].mxu1 %v220_v35  ;;  %556 = vmatprep.mubr.f32.mxu0 %v224_v36 }
  0x67   : > { %854 = vmatprep.mubr.f32.mxu1 %v224_v36 }
  0x69   : > { %557 = vmatmul.mubr.f32.gmra.mrb[12].mxu0 %v223_v37 }
  0x6a   : > { %855 = vmatmul.mubr.f32.gmra.mrb[12].mxu1 %v223_v37  ;;  %562 = vmatprep.mubr.f32.mxu0 %v227_v38 }
  0x6b   : > { %860 = vmatprep.mubr.f32.mxu1 %v227_v38 }
  0x6d   : > { %563 = vmatmul.mubr.f32.gmra.mrb[14].mxu0 %v226_v39 }
  0x6e   : > { %861 = vmatmul.mubr.f32.gmra.mrb[14].mxu1 %v226_v39  ;;  %568 = vmatprep.mubr.f32.mxu0 %v230_v40 }
  0x6f   : > { %866 = vmatprep.mubr.f32.mxu1 %v230_v40 }
  0x71   : > { %569 = vmatmul.mubr.f32.gmra.mrb[16].mxu0 %v229_v41 }
  0x72   : > { %867 = vmatmul.mubr.f32.gmra.mrb[16].mxu1 %v229_v41  ;;  %574 = vmatprep.mubr.f32.mxu0 %v233_v42 }
  0x73   : > { %872 = vmatprep.mubr.f32.mxu1 %v233_v42 }
  0x75   : > { %575 = vmatmul.mubr.f32.gmra.mrb[18].mxu0 %v232_v43 }
  0x76   : > { %873 = vmatmul.mubr.f32.gmra.mrb[18].mxu1 %v232_v43  ;;  %580 = vmatprep.mubr.f32.mxu0 %v236_v44 }
  0x77   : > { %878 = vmatprep.mubr.f32.mxu1 %v236_v44 }
  0x79   : > { %581 = vmatmul.mubr.f32.gmra.mrb[20].mxu0 %v235_v45 }
  0x7a   : > { %879 = vmatmul.mubr.f32.gmra.mrb[20].mxu1 %v235_v45  ;;  %586 = vmatprep.mubr.f32.mxu0 %v239_v46 }
  0x7b   : > { %884 = vmatprep.mubr.f32.mxu1 %v239_v46 }
  0x7d   : > { %587 = vmatmul.mubr.f32.gmra.mrb[22].mxu0 %v238_v47 }
  0x7e   : > { %885 = vmatmul.mubr.f32.gmra.mrb[22].mxu1 %v238_v47  ;;  %592 = vmatprep.mubr.f32.mxu0 %v242_v48 }
  0x7f   : > { %890 = vmatprep.mubr.f32.mxu1 %v242_v48 }
  0x81   : > { %593 = vmatmul.mubr.f32.gmra.mrb[24].mxu0 %v241_v49 }
  0x82   : > { %891 = vmatmul.mubr.f32.gmra.mrb[24].mxu1 %v241_v49  ;;  %598 = vmatprep.mubr.f32.mxu0 %v245_v50 }
  0x83   : > { %896 = vmatprep.mubr.f32.mxu1 %v245_v50 }
  0x85   : > { %599 = vmatmul.mubr.f32.gmra.mrb[26].mxu0 %v244_v51 }
  0x86   : > { %897 = vmatmul.mubr.f32.gmra.mrb[26].mxu1 %v244_v51  ;;  %669 = vmatprep.mubr.f32.mxu0 %v1602_v52 }
  0x87   : > { %967 = vmatprep.mubr.f32.mxu1 %v1602_v52 }
  0x89   : > { %1198 = vmatmul.mubr.msk.f32.vlgmr.msra.gmra.mrb[0].mxu0 %vm413_vm0, %v207_v53 }
  0x8a   : > { %1212 = vmatmul.mubr.msk.f32.vlgmr.msra.gmra.mrb[0].mxu1 %vm413_vm0, %v207_v53  ;;  %675 = vmatprep.mubr.f32.mxu0 %v1602_v52 }
  0x8b   : > { %973 = vmatprep.mubr.f32.mxu1 %v1602_v52 }
  0x8d   : > { %1199 = vmatmul.mubr.msk.f32.gmra.mrb[2].mxu0 %vm413_vm0, %v210_v54 }
  0x8e   : > { %1213 = vmatmul.mubr.msk.f32.gmra.mrb[2].mxu1 %vm413_vm0, %v210_v54  ;;  %681 = vmatprep.mubr.f32.mxu0 %v1602_v52 }
  0x8f   : > { %979 = vmatprep.mubr.f32.mxu1 %v1602_v52 }
  0x91   : > { %1200 = vmatmul.mubr.msk.f32.gmra.mrb[4].mxu0 %vm413_vm0, %v213_v55 }
  0x92   : > { %1214 = vmatmul.mubr.msk.f32.gmra.mrb[4].mxu1 %vm413_vm0, %v213_v55  ;;  %687 = vmatprep.mubr.f32.mxu0 %v1602_v52 }
  0x93   : > { %985 = vmatprep.mubr.f32.mxu1 %v1602_v52 }
  0x95   : > { %1201 = vmatmul.mubr.msk.f32.gmra.mrb[6].mxu0 %vm413_vm0, %v216_v56 }
  0x96   : > { %1215 = vmatmul.mubr.msk.f32.gmra.mrb[6].mxu1 %vm413_vm0, %v216_v56  ;;  %693 = vmatprep.mubr.f32.mxu0 %v1602_v52 }
  0x97   : > { %991 = vmatprep.mubr.f32.mxu1 %v1602_v52 }
  0x99   : > { %1202 = vmatmul.mubr.msk.f32.gmra.mrb[8].mxu0 %vm413_vm0, %v219_v57 }
  0x9a   : > { %1216 = vmatmul.mubr.msk.f32.gmra.mrb[8].mxu1 %vm413_vm0, %v219_v57  ;;  %699 = vmatprep.mubr.f32.mxu0 %v1602_v52 }
  0x9b   : > { %997 = vmatprep.mubr.f32.mxu1 %v1602_v52 }
  0x9d   : > { %1203 = vmatmul.mubr.msk.f32.gmra.mrb[10].mxu0 %vm413_vm0, %v222_v58 }
  0x9e   : > { %1217 = vmatmul.mubr.msk.f32.gmra.mrb[10].mxu1 %vm413_vm0, %v222_v58  ;;  %705 = vmatprep.mubr.f32.mxu0 %v1602_v52 }
  0x9f   : > { %1003 = vmatprep.mubr.f32.mxu1 %v1602_v52 }
  0xa1   : > { %1204 = vmatmul.mubr.msk.f32.gmra.mrb[12].mxu0 %vm413_vm0, %v225_v59 }
  0xa2   : > { %1218 = vmatmul.mubr.msk.f32.gmra.mrb[12].mxu1 %vm413_vm0, %v225_v59  ;;  %711 = vmatprep.mubr.f32.mxu0 %v1602_v52 }
  0xa3   : > { %1009 = vmatprep.mubr.f32.mxu1 %v1602_v52 }
  0xa5   : > { %1205 = vmatmul.mubr.msk.f32.gmra.mrb[14].mxu0 %vm413_vm0, %v228_v60 }
  0xa6   : > { %1219 = vmatmul.mubr.msk.f32.gmra.mrb[14].mxu1 %vm413_vm0, %v228_v60  ;;  %717 = vmatprep.mubr.f32.mxu0 %v1602_v52 }
  0xa7   : > { %1015 = vmatprep.mubr.f32.mxu1 %v1602_v52 }
  0xa9   : > { %1206 = vmatmul.mubr.msk.f32.gmra.mrb[16].mxu0 %vm413_vm0, %v231_v61 }
  0xaa   : > { %1220 = vmatmul.mubr.msk.f32.gmra.mrb[16].mxu1 %vm413_vm0, %v231_v61  ;;  %723 = vmatprep.mubr.f32.mxu0 %v1602_v52 }
  0xab   : > { %1021 = vmatprep.mubr.f32.mxu1 %v1602_v52 }
  0xad   : > { %1207 = vmatmul.mubr.msk.f32.gmra.mrb[18].mxu0 %vm413_vm0, %v234_v62 }
  0xae   : > { %1221 = vmatmul.mubr.msk.f32.gmra.mrb[18].mxu1 %vm413_vm0, %v234_v62  ;;  %729 = vmatprep.mubr.f32.mxu0 %v1602_v52 }
  0xaf   : > { %1027 = vmatprep.mubr.f32.mxu1 %v1602_v52 }
  0xb1   : > { %1208 = vmatmul.mubr.msk.f32.gmra.mrb[20].mxu0 %vm413_vm0, %v237_v63 }
  0xb2   : > { %1222 = vmatmul.mubr.msk.f32.gmra.mrb[20].mxu1 %vm413_vm0, %v237_v63  ;;  %735 = vmatprep.mubr.f32.mxu0 %v1602_v52 }
  0xb3   : > { %1033 = vmatprep.mubr.f32.mxu1 %v1602_v52 }
  0xb5   : > { %1209 = vmatmul.mubr.msk.f32.gmra.mrb[22].mxu0 %vm413_vm0, %v240_v0 }
  0xb6   : > { %1223 = vmatmul.mubr.msk.f32.gmra.mrb[22].mxu1 %vm413_vm0, %v240_v0  ;;  %741 = vmatprep.mubr.f32.mxu0 %v1602_v52 }
  0xb7   : > { %1039 = vmatprep.mubr.f32.mxu1 %v1602_v52 }
  0xb9   : > { %1210 = vmatmul.mubr.msk.f32.gmra.mrb[24].mxu0 %vm413_vm0, %v243_v1 }
  0xba   : > { %1224 = vmatmul.mubr.msk.f32.gmra.mrb[24].mxu1 %vm413_vm0, %v243_v1  ;;  %747 = vmatprep.mubr.f32.mxu0 %v1602_v52 }
  0xbb   : > { %1045 = vmatprep.mubr.f32.mxu1 %v1602_v52 }
  0xbd   : > { %1211 = vmatmul.mubr.msk.f32.gmra.mrb[26].mxu0 %vm413_vm0, %v246_v2 }
  0xbe   : > { %1225 = vmatmul.mubr.msk.f32.gmra.mrb[26].mxu1 %vm413_vm0, %v246_v2 }
 0x15c   : > { %v671_v14 = vpop.f32.mrb[0].mxu0 }
 0x15d   : > { %v1383_v15 = vadd.f32 %v671_v14, %v2225_v10  ;;  %v969_v16 = vpop.f32.mrb[0].mxu1  ;;  %v673_v17 = vpop.f32.mrb[1].mxu0 }
 0x15e   : > { %v1411_v18 = vadd.f32 %v969_v16, %v2227_v11  ;;  %v1384_v19 = vadd.f32 %v673_v17, %v2229_v12  ;;  %v971_v20 = vpop.f32.mrb[1].mxu1 }
 0x15f   : > { %1052 = vst [vmem:[%s2236_s17] sm:$0xff] %v1383_v15  ;;  %v1412_v21 = vadd.f32 %v971_v20, %v2231_v13 }
 0x160   : > { %1054 = vst [vmem:[%s2236_s17 + $0x10] sm:$0xff] %v1411_v18  ;;  %1053 = vst [vmem:[%s2236_s17 + $0x8] sm:$0xff] %v1384_v19  ;;  %v677_v22 = vpop.f32.mrb[2].mxu0 }
 0x161   : > { %1056 = vst.msk [vmem:[%s2236_s17 + $0x18] sm:$0xff] %vm1055_vm1, %v1412_v21  ;;  %v1385_v23 = vadd.f32 %v677_v22, %v2225_v10  ;;  %v975_v24 = vpop.f32.mrb[2].mxu1  ;;  %v679_v25 = vpop.f32.mrb[3].mxu0 }
 0x162   : > { %v1413_v26 = vadd.f32 %v975_v24, %v2227_v11  ;;  %v1386_v27 = vadd.f32 %v679_v25, %v2229_v12  ;;  %v977_v28 = vpop.f32.mrb[3].mxu1 }
 0x163   : > { %1057 = vst [vmem:[%s2236_s17 + $0x20] sm:$0xff] %v1385_v23  ;;  %v1414_v29 = vadd.f32 %v977_v28, %v2231_v13 }
 0x164   : > { %1059 = vst [vmem:[%s2236_s17 + $0x30] sm:$0xff] %v1413_v26  ;;  %1058 = vst [vmem:[%s2236_s17 + $0x28] sm:$0xff] %v1386_v27  ;;  %v683_v30 = vpop.f32.mrb[4].mxu0 }
 0x165   : > { %1060 = vst.msk [vmem:[%s2236_s17 + $0x38] sm:$0xff] %vm1055_vm1, %v1414_v29  ;;  %v1387_v31 = vadd.f32 %v683_v30, %v2225_v10  ;;  %v981_v32 = vpop.f32.mrb[4].mxu1  ;;  %v685_v33 = vpop.f32.mrb[5].mxu0 }
 0x166   : > { %v1415_v34 = vadd.f32 %v981_v32, %v2227_v11  ;;  %v1388_v35 = vadd.f32 %v685_v33, %v2229_v12  ;;  %v983_v36 = vpop.f32.mrb[5].mxu1 }
 0x167   : > { %1061 = vst [vmem:[%s2236_s17 + $0x40] sm:$0xff] %v1387_v31  ;;  %v1416_v37 = vadd.f32 %v983_v36, %v2231_v13 }
 0x168   : > { %1063 = vst [vmem:[%s2236_s17 + $0x50] sm:$0xff] %v1415_v34  ;;  %1062 = vst [vmem:[%s2236_s17 + $0x48] sm:$0xff] %v1388_v35  ;;  %v689_v38 = vpop.f32.mrb[6].mxu0 }
 0x169   : > { %1064 = vst.msk [vmem:[%s2236_s17 + $0x58] sm:$0xff] %vm1055_vm1, %v1416_v37  ;;  %v1389_v39 = vadd.f32 %v689_v38, %v2225_v10  ;;  %v987_v40 = vpop.f32.mrb[6].mxu1  ;;  %v691_v41 = vpop.f32.mrb[7].mxu0 }
 0x16a   : > { %v1417_v42 = vadd.f32 %v987_v40, %v2227_v11  ;;  %v1390_v43 = vadd.f32 %v691_v41, %v2229_v12  ;;  %v989_v44 = vpop.f32.mrb[7].mxu1 }
 0x16b   : > { %1065 = vst [vmem:[%s2236_s17 + $0x60] sm:$0xff] %v1389_v39  ;;  %v1418_v45 = vadd.f32 %v989_v44, %v2231_v13 }
 0x16c   : > { %1067 = vst [vmem:[%s2236_s17 + $0x70] sm:$0xff] %v1417_v42  ;;  %1066 = vst [vmem:[%s2236_s17 + $0x68] sm:$0xff] %v1390_v43  ;;  %v695_v46 = vpop.f32.mrb[8].mxu0 }
 0x16d   : > { %1068 = vst.msk [vmem:[%s2236_s17 + $0x78] sm:$0xff] %vm1055_vm1, %v1418_v45  ;;  %v1391_v47 = vadd.f32 %v695_v46, %v2225_v10  ;;  %v993_v48 = vpop.f32.mrb[8].mxu1  ;;  %v697_v49 = vpop.f32.mrb[9].mxu0 }
 0x16e   : > { %v1419_v50 = vadd.f32 %v993_v48, %v2227_v11  ;;  %v1392_v51 = vadd.f32 %v697_v49, %v2229_v12  ;;  %v995_v52 = vpop.f32.mrb[9].mxu1 }
 0x16f   : > { %1069 = vst [vmem:[%s2236_s17 + $0x80] sm:$0xff] %v1391_v47  ;;  %v1420_v53 = vadd.f32 %v995_v52, %v2231_v13 }
 0x170   : > { %1071 = vst [vmem:[%s2236_s17 + $0x90] sm:$0xff] %v1419_v50  ;;  %1070 = vst [vmem:[%s2236_s17 + $0x88] sm:$0xff] %v1392_v51  ;;  %v701_v54 = vpop.f32.mrb[10].mxu0 }
 0x171   : > { %1072 = vst.msk [vmem:[%s2236_s17 + $0x98] sm:$0xff] %vm1055_vm1, %v1420_v53  ;;  %v1393_v55 = vadd.f32 %v701_v54, %v2225_v10  ;;  %v999_v56 = vpop.f32.mrb[10].mxu1  ;;  %v703_v57 = vpop.f32.mrb[11].mxu0 }
 0x172   : > { %v1421_v58 = vadd.f32 %v999_v56, %v2227_v11  ;;  %v1394_v59 = vadd.f32 %v703_v57, %v2229_v12  ;;  %v1001_v60 = vpop.f32.mrb[11].mxu1 }
 0x173   : > { %1073 = vst [vmem:[%s2236_s17 + $0xa0] sm:$0xff] %v1393_v55  ;;  %v1422_v61 = vadd.f32 %v1001_v60, %v2231_v13 }
 0x174   : > { %1075 = vst [vmem:[%s2236_s17 + $0xb0] sm:$0xff] %v1421_v58  ;;  %1074 = vst [vmem:[%s2236_s17 + $0xa8] sm:$0xff] %v1394_v59  ;;  %v707_v62 = vpop.f32.mrb[12].mxu0 }
 0x175   : > { %1076 = vst.msk [vmem:[%s2236_s17 + $0xb8] sm:$0xff] %vm1055_vm1, %v1422_v61  ;;  %v1395_v63 = vadd.f32 %v707_v62, %v2225_v10  ;;  %v1005_v0 = vpop.f32.mrb[12].mxu1  ;;  %v709_v1 = vpop.f32.mrb[13].mxu0 }
 0x176   : > { %v1423_v2 = vadd.f32 %v1005_v0, %v2227_v11  ;;  %v1396_v3 = vadd.f32 %v709_v1, %v2229_v12  ;;  %v1007_v4 = vpop.f32.mrb[13].mxu1 }
 0x177   : > { %1077 = vst [vmem:[%s2236_s17 + $0xc0] sm:$0xff] %v1395_v63  ;;  %v1424_v5 = vadd.f32 %v1007_v4, %v2231_v13 }
 0x178   : > { %1079 = vst [vmem:[%s2236_s17 + $0xd0] sm:$0xff] %v1423_v2  ;;  %1078 = vst [vmem:[%s2236_s17 + $0xc8] sm:$0xff] %v1396_v3  ;;  %v713_v6 = vpop.f32.mrb[14].mxu0 }
 0x179   : > { %1080 = vst.msk [vmem:[%s2236_s17 + $0xd8] sm:$0xff] %vm1055_vm1, %v1424_v5  ;;  %v1397_v7 = vadd.f32 %v713_v6, %v2225_v10  ;;  %v1011_v8 = vpop.f32.mrb[14].mxu1  ;;  %v715_v9 = vpop.f32.mrb[15].mxu0 }
 0x17a   : > { %v1425_v14 = vadd.f32 %v1011_v8, %v2227_v11  ;;  %v1398_v15 = vadd.f32 %v715_v9, %v2229_v12  ;;  %v1013_v16 = vpop.f32.mrb[15].mxu1 }
 0x17b   : > { %1081 = vst [vmem:[%s2236_s17 + $0xe0] sm:$0xff] %v1397_v7  ;;  %v1426_v17 = vadd.f32 %v1013_v16, %v2231_v13 }
 0x17c   : > { %1083 = vst [vmem:[%s2236_s17 + $0xf0] sm:$0xff] %v1425_v14  ;;  %1082 = vst [vmem:[%s2236_s17 + $0xe8] sm:$0xff] %v1398_v15  ;;  %v719_v18 = vpop.f32.mrb[16].mxu0 }
 0x17d   : > { %1084 = vst.msk [vmem:[%s2236_s17 + $0xf8] sm:$0xff] %vm1055_vm1, %v1426_v17  ;;  %v1399_v19 = vadd.f32 %v719_v18, %v2225_v10  ;;  %v1017_v20 = vpop.f32.mrb[16].mxu1  ;;  %v721_v21 = vpop.f32.mrb[17].mxu0 }
 0x17e   : > { %v1427_v22 = vadd.f32 %v1017_v20, %v2227_v11  ;;  %v1400_v23 = vadd.f32 %v721_v21, %v2229_v12  ;;  %v1019_v24 = vpop.f32.mrb[17].mxu1 }
 0x17f   : > { %1085 = vst [vmem:[%s2236_s17 + $0x100] sm:$0xff] %v1399_v19  ;;  %v1428_v25 = vadd.f32 %v1019_v24, %v2231_v13 }
 0x180   : > { %1087 = vst [vmem:[%s2236_s17 + $0x110] sm:$0xff] %v1427_v22  ;;  %1086 = vst [vmem:[%s2236_s17 + $0x108] sm:$0xff] %v1400_v23  ;;  %v725_v26 = vpop.f32.mrb[18].mxu0 }
 0x181   : > { %1088 = vst.msk [vmem:[%s2236_s17 + $0x118] sm:$0xff] %vm1055_vm1, %v1428_v25  ;;  %v1401_v27 = vadd.f32 %v725_v26, %v2225_v10  ;;  %v1023_v28 = vpop.f32.mrb[18].mxu1  ;;  %v727_v29 = vpop.f32.mrb[19].mxu0 }
 0x182   : > { %v1429_v30 = vadd.f32 %v1023_v28, %v2227_v11  ;;  %v1402_v31 = vadd.f32 %v727_v29, %v2229_v12  ;;  %v1025_v32 = vpop.f32.mrb[19].mxu1 }
 0x183   : > { %1089 = vst [vmem:[%s2236_s17 + $0x120] sm:$0xff] %v1401_v27  ;;  %v1430_v33 = vadd.f32 %v1025_v32, %v2231_v13 }
 0x184   : > { %1091 = vst [vmem:[%s2236_s17 + $0x130] sm:$0xff] %v1429_v30  ;;  %1090 = vst [vmem:[%s2236_s17 + $0x128] sm:$0xff] %v1402_v31  ;;  %v731_v34 = vpop.f32.mrb[20].mxu0 }
 0x185   : > { %1092 = vst.msk [vmem:[%s2236_s17 + $0x138] sm:$0xff] %vm1055_vm1, %v1430_v33  ;;  %v1403_v35 = vadd.f32 %v731_v34, %v2225_v10  ;;  %v1029_v36 = vpop.f32.mrb[20].mxu1  ;;  %v733_v37 = vpop.f32.mrb[21].mxu0 }
 0x186   : > { %v1431_v38 = vadd.f32 %v1029_v36, %v2227_v11  ;;  %v1404_v39 = vadd.f32 %v733_v37, %v2229_v12  ;;  %v1031_v40 = vpop.f32.mrb[21].mxu1 }
 0x187   : > { %1093 = vst [vmem:[%s2236_s17 + $0x140] sm:$0xff] %v1403_v35  ;;  %v1432_v41 = vadd.f32 %v1031_v40, %v2231_v13 }
 0x188   : > { %1095 = vst [vmem:[%s2236_s17 + $0x150] sm:$0xff] %v1431_v38  ;;  %1094 = vst [vmem:[%s2236_s17 + $0x148] sm:$0xff] %v1404_v39  ;;  %v737_v42 = vpop.f32.mrb[22].mxu0 }
 0x189   : > { %1096 = vst.msk [vmem:[%s2236_s17 + $0x158] sm:$0xff] %vm1055_vm1, %v1432_v41  ;;  %v1405_v43 = vadd.f32 %v737_v42, %v2225_v10  ;;  %v1035_v44 = vpop.f32.mrb[22].mxu1  ;;  %v739_v45 = vpop.f32.mrb[23].mxu0 }
 0x18a   : > { %v1433_v46 = vadd.f32 %v1035_v44, %v2227_v11  ;;  %v1406_v47 = vadd.f32 %v739_v45, %v2229_v12  ;;  %v1037_v48 = vpop.f32.mrb[23].mxu1 }
 0x18b   : > { %1097 = vst [vmem:[%s2236_s17 + $0x160] sm:$0xff] %v1405_v43  ;;  %v1434_v49 = vadd.f32 %v1037_v48, %v2231_v13 }
 0x18c   : > { %1099 = vst [vmem:[%s2236_s17 + $0x170] sm:$0xff] %v1433_v46  ;;  %1098 = vst [vmem:[%s2236_s17 + $0x168] sm:$0xff] %v1406_v47  ;;  %v743_v50 = vpop.f32.mrb[24].mxu0 }
 0x18d   : > { %1100 = vst.msk [vmem:[%s2236_s17 + $0x178] sm:$0xff] %vm1055_vm1, %v1434_v49  ;;  %v1407_v51 = vadd.f32 %v743_v50, %v2225_v10  ;;  %v1041_v52 = vpop.f32.mrb[24].mxu1  ;;  %v745_v53 = vpop.f32.mrb[25].mxu0 }
 0x18e   : > { %v1435_v54 = vadd.f32 %v1041_v52, %v2227_v11  ;;  %v1408_v55 = vadd.f32 %v745_v53, %v2229_v12  ;;  %v1043_v56 = vpop.f32.mrb[25].mxu1 }
 0x18f   : > { %1101 = vst [vmem:[%s2236_s17 + $0x180] sm:$0xff] %v1407_v51  ;;  %v1436_v57 = vadd.f32 %v1043_v56, %v2231_v13  ;;  %1116 = sbr.rel (!%p1664_p5) target bundleno = 434 (0x1b2), region = 36 }
 0x190   : > { %1103 = vst [vmem:[%s2236_s17 + $0x190] sm:$0xff] %v1435_v54  ;;  %1102 = vst [vmem:[%s2236_s17 + $0x188] sm:$0xff] %v1408_v55  ;;  %v749_v58 = vpop.f32.mrb[26].mxu0 }
 0x191   : > { %1104 = vst.msk [vmem:[%s2236_s17 + $0x198] sm:$0xff] %vm1055_vm1, %v1436_v57  ;;  %v1409_v59 = vadd.f32 %v749_v58, %v2225_v10  ;;  %v1047_v60 = vpop.f32.mrb[26].mxu1  ;;  %v751_v61 = vpop.f32.mrb[27].mxu0 }
 0x192   : > { %v1437_v62 = vadd.f32 %v1047_v60, %v2227_v11  ;;  %v1410_v63 = vadd.f32 %v751_v61, %v2229_v12  ;;  %v1049_v0 = vpop.f32.mrb[27].mxu1 }
 0x193   : > { %1105 = vst [vmem:[%s2236_s17 + $0x1a0] sm:$0xff] %v1409_v59  ;;  %v1438_v1 = vadd.f32 %v1049_v0, %v2231_v13 }
 0x194   : > { %1107 = vst [vmem:[%s2236_s17 + $0x1b0] sm:$0xff] %v1437_v62  ;;  %1106 = vst [vmem:[%s2236_s17 + $0x1a8] sm:$0xff] %v1410_v63 }
 0x195   : > { %1108 = vst.msk [vmem:[%s2236_s17 + $0x1b8] sm:$0xff] %vm1055_vm1, %v1438_v1 }
 0x196   : > { %s2435_s6 = smov (!%p1119_p11, %s1118_s6), 14 }
 0x197   : > { %s2368_s10 = sshll.u32 %s2435_s6, 9 }
 0x198   : > { %s1124_s11 = ssub.s32 7168, %s2368_s10 }
 0x199   : > { %1125 = vsyncadd %s2363_s5, %s1124_s11  ;;  %p1228_p12 = scmp.ne.s32.totalorder %s2368_s10, 0  ;;  %s1238_s19 = smul.u32 7168, %s1647_s16 }
 0x19a   : > { %s1131_s20 = sshll.u32 %s2236_s17, 4  ;;  %s1603_s25 = smov [#allocation2]   ;;  %s2380_s20 = int_to_ptr.vmem [resolvable:$true] %s1131_s20 }
 0x19b   : > { %s2378_s7 = scalar_lea.hbm %s2427_s3, %s1238_s19  ;;  %s1538_s9 = scalar_lea.vmem %s2380_s20, %s2368_s10 }
 0x19c   : > { %p1539_p13 = scmp.ne.s32.totalorder %s2380_s20, %s1538_s9  ;;  %s1542_s26 = sshll.u32 %s1603_s25, 4  ;;  %s1543_s26 = int_to_ptr.vmem [resolvable:$false] %s1542_s26 }
 0x19d   : > { %s1544_s16 = scalar_lea.vmem %s1543_s26, 14336  ;;  %p1545_p2 = scmp.lt.s32.totalorder %s2380_s20, %s1543_s26 }
 0x19e   : > { %p1540_p0 = pnand %p1539_p13, %p1228_p12  ;;  %p1546_p3 = scmp.lt.s32.totalorder %s1544_s16, %s1538_s9 }
 0x1a0   : > { %p1541_p1 = pneg %p1540_p0  ;;  %p1547_p4 = por %p1546_p3, %p1545_p2 }
 0x1a2   : > { %p1548_p5 = pnand %p1547_p4, %p1541_p1 }
 0x1a4   : > { %1551 = shalt.err (!%p1548_p5)
}
 0x1a5   : > { %s1552_s8 = scalar_lea.hbm %s2378_s7, %s2368_s10  ;;  %s1556_s29 = scalar_lea.hbm %s2427_s3, 12800 }
 0x1a6   : > { %p1553_p7 = scmp.ne.s32.totalorder %s2378_s7, %s1552_s8  ;;  %p1557_p10 = scmp.lt.u32.totalorder %s2378_s7, %s2427_s3 }
 0x1a7   : > { %p1558_p11 = scmp.lt.u32.totalorder %s1556_s29, %s1552_s8  ;;  %p1560_p0 = scmp.lt.u32.totalorder %s1552_s8, %s2378_s7 }
 0x1a8   : > { %p1554_p8 = pnand %p1553_p7, %p1228_p12 }
 0x1a9   : > { %p1559_p13 = por %p1558_p11, %p1557_p10 }
 0x1aa   : > { %p1555_p9 = pneg %p1554_p8 }
 0x1ab   : > { %p1561_p1 = por %p1560_p0, %p1559_p13 }
 0x1ad   : > { %p1562_p2 = pnand %p1561_p1, %p1555_p9 }
 0x1af   : > { %1565 = shalt.err (!%p1562_p2)
}
 0x1b0   : > { %s1604_s17 = smov 512   ;;  %s1605_s6 = smov 32  }
 0x1b1   : > { %1137 = dma.vmem_to_hbm [thread:$0]  (%p1228_p12), %s2380_s20, %s2368_s10, %s2378_s7, %s2363_s5, %s1604_s17, %s1604_s17, %s1605_s6  }
 0x1b2 PF: > { %p1502_p3 = scmp.ge.s32.totalorder %s1600_s15, 2  ;;  %s1146_s11 = sand.u32 1, %s1588_s12  }
 0x1b3   : > { %s1147_s19 = scalar_lea.sflag [#allocation3], %s1146_s11 }
 0x1b4   : > { %p1499_p4 = pnand %p1502_p3, %p1668_p6 }
 0x1b6   : > { %1583 = dma.done.wait (!%p1499_p4), %s1147_s19, 7168  }
 0x1b7   : > { %1585 = vsyncadd (!%p1499_p4), %s1147_s19, 4294960128  ;;  %p13_p5 = scmp.ge.s32.totalorder %s1651_s18, 4   ;;  %s2430_s12 = smov %s1592_s13 }
 0x1b8   : > { %s2431_s13 = smov %s1596_s14  ;;  %s2432_s14 = smov %s1662_s21 }
 0x1b9   : > { %s2433_s15 = smov %s1651_s18  ;;  %15 = sbr.rel (!%p13_p5) target bundleno = 3 (0x3), region = 67 }
 0x1c0   :  { %1152 = vsyncpa [#allocation3], 1 }
 0x1c1   :  { %1154 = vsyncpa [#allocation3 + $0x1], 1 }

</bundles_post_ra>
